<compile_context>
chip_gen: v7x
topology: tpu7x:2x2x1
jax: 0.10.0
libtpu: 0.0.40
codegen_flags: <defaults>
</compile_context>

<pallas_src>
import functools

import jax
import jax.numpy as jnp
from jax.experimental import pallas as pl
from jax.experimental.pallas import tpu as pltpu


def _round_up(x, m):
    return ((x + m - 1) // m) * m


def _pick_tile(size, align, cap):
    """Balanced tile (multiple of `align`, <= `cap`) minimising padded area."""
    size_al = _round_up(size, align)
    if size_al <= cap:
        return size_al
    stripes = -(-size_al // cap)                    # cdiv
    return min(_round_up(-(-size_al // stripes), align), cap)


# ---------------------------------------------------------------------------
# Kernel 1: per-row inverse L2 norms for B (K-tiled so huge D stays in VMEM).
# ---------------------------------------------------------------------------
def _row_inv_norm_kernel(x_ref, o_ref):
    k = pl.program_id(1)

    @pl.when(k == 0)
    def _():
        o_ref[...] = jnp.zeros_like(o_ref)

    x = x_ref[...].astype(jnp.float32)
    o_ref[...] += jnp.sum(x * x, axis=1, keepdims=True)

    @pl.when(k == pl.num_programs(1) - 1)
    def _():
        # Matches F.normalize: divide by max(||x||, 1e-12), eps math in f32.
        o_ref[...] = 1.0 / jnp.maximum(jnp.sqrt(o_ref[...]), jnp.float32(1e-12))


def _row_inv_norms(x_padded, tile_rows, tile_k):
    rows, d_pad = x_padded.shape
    return pl.pallas_call(
        _row_inv_norm_kernel,
        out_shape=jax.ShapeDtypeStruct((rows, 1), jnp.float32),
        grid=(rows // tile_rows, d_pad // tile_k),
        in_specs=[pl.BlockSpec((tile_rows, tile_k), lambda i, k: (i, k))],
        out_specs=pl.BlockSpec((tile_rows, 1), lambda i, k: (i, 0)),
        compiler_params=pltpu.CompilerParams(
            dimension_semantics=("parallel", "arbitrary")),
    )(x_padded)


# ---------------------------------------------------------------------------
# Kernel 2: K-tiled sim = A @ B^T (NT dot_general), fused A row norms,
# rank-1 inverse-norm scaling, clamp, -log(1-x), (8,128) partial per (i, j).
# ---------------------------------------------------------------------------
def _loss_tile_kernel(a_ref, b_ref, inv_b_ref, o_ref, acc_ref, ssq_ref, *,
                      tm, tn, precision):
    k = pl.program_id(2)

    @pl.when(k == 0)
    def _():
        acc_ref[...] = jnp.zeros_like(acc_ref)
        ssq_ref[...] = jnp.zeros_like(ssq_ref)

    a = a_ref[...]                                     # (tm, tk) input dtype
    b = b_ref[...]                                     # (tn, tk) input dtype

    # NT contraction straight on the MXU (no transpose of B anywhere).
    acc_ref[...] += jax.lax.dot_general(
        a, b, dimension_numbers=(((1,), (1,)), ((), ())),
        preferred_element_type=jnp.float32, precision=precision)

    # Fused A row-norm accumulation (f32), hidden under the MXU/EUP work.
    a32 = a.astype(jnp.float32)
    ssq_ref[...] += jnp.sum(a32 * a32, axis=1, keepdims=True)

    @pl.when(k == pl.num_programs(2) - 1)
    def _():
        inv_a = 1.0 / jnp.maximum(jnp.sqrt(ssq_ref[...]), jnp.float32(1e-12))
        sim = acc_ref[...] * inv_a * inv_b_ref[...]    # (tm, tn) cosine sim
        sim = jnp.clip(sim, jnp.float32(0.0005), jnp.float32(0.9995))
        loss = -jnp.log(1.0 - sim)

        # Layout-aligned reduction to an (8, 128) vreg-shaped partial:
        # sublane-group fold (pure VALU adds) then 128-wide lane-tile folds.
        part = jnp.sum(loss.reshape(tm // 8, 8, tn), axis=0)   # (8, tn)
        acc128 = part[:, 0:128]
        for t in range(1, tn // 128):
            acc128 = acc128 + part[:, t * 128:(t + 1) * 128]
        o_ref[...] = acc128.reshape(1, 1, 8, 128)


def shared_special_loss(embedded_a, embedded_b, *, precision=None):
    """embedded_a: [N, D], embedded_b: [M, D] -> scalar loss (float32)."""
    n, d = embedded_a.shape
    m, d_b = embedded_b.shape
    assert d == d_b, "feature dims must match"

    if precision is None:
        # fp32 parity with the PyTorch reference; bf16 inputs keep default.
        precision = (jax.lax.Precision.HIGHEST
                     if embedded_a.dtype == jnp.float32
                     else jax.lax.Precision.DEFAULT)

    # Balanced tiles minimising padded area (lane dims multiples of 128,
    # sublane multiples of 8). Caps keep every generation's VMEM happy.
    tm = _pick_tile(n, 8, 512)
    tn = _pick_tile(m, 128, 512)
    tk = _pick_tile(d, 128, 1024)
    n_pad = _round_up(n, tm)
    m_pad = _round_up(m, tn)
    d_pad = _round_up(d, tk)

    a_p = jnp.pad(embedded_a, ((0, n_pad - n), (0, d_pad - d)))
    b_p = jnp.pad(embedded_b, ((0, m_pad - m), (0, d_pad - d)))

    # B inverse row norms precomputed once; padded entries zeroed (robustness:
    # guarantees padded columns clip to exactly 0.0005 for the constant fixup).
    inv_b = _row_inv_norms(b_p, tn, tk).reshape(1, m_pad)
    if m_pad != m:
        inv_b = inv_b.at[:, m:].set(0.0)

    gn, gm, gk = n_pad // tm, m_pad // tn, d_pad // tk
    isz = a_p.dtype.itemsize

    # VMEM budget from the actual tile footprint (double-buffered inputs +
    # f32 accumulators), capped well under v7x's 64 MiB physical VMEM.
    tile_bytes = (2 * (tm * tk + tn * tk) * isz       # A, B tiles (x2 buffers)
                  + 2 * tn * 4 + 2 * 8 * 128 * 4      # inv_b + output blocks
                  + tm * tn * 4 + tm * 4)             # acc + ssq scratch
    vmem_limit = int(min(max(tile_bytes * 3 // 2 + (4 << 20), 16 << 20), 48 << 20))

    cost = pl.CostEstimate(
        flops=2 * n_pad * m_pad * d_pad,
        transcendentals=n_pad * m_pad,                # -log(1 - sim)
        bytes_accessed=(gm * n_pad * d_pad * isz + gn * m_pad * d_pad * isz
                        + gn * gm * 8 * 128 * 4 + m_pad * 4))

    kernel = functools.partial(_loss_tile_kernel, tm=tm, tn=tn,
                               precision=precision)

    partials = pl.pallas_call(
        kernel,
        out_shape=jax.ShapeDtypeStruct((gn, gm, 8, 128), jnp.float32),
        grid=(gn, gm, gk),
        in_specs=[
            pl.BlockSpec((tm, tk), lambda i, j, k: (i, k)),   # A row panel
            pl.BlockSpec((tn, tk), lambda i, j, k: (j, k)),   # B row panel (NT)
            pl.BlockSpec((1, tn), lambda i, j, k: (0, j)),    # inv ||b_j||
        ],
        out_specs=pl.BlockSpec((1, 1, 8, 128), lambda i, j, k: (i, j, 0, 0)),
        scratch_shapes=[pltpu.VMEM((tm, tn), jnp.float32),    # sim accumulator
                        pltpu.VMEM((tm, 1), jnp.float32)],    # sum(a*a) accum
        compiler_params=pltpu.CompilerParams(
            dimension_semantics=("parallel", "parallel", "arbitrary"),
            vmem_limit_bytes=vmem_limit),
        cost_estimate=cost,
    )(a_p, b_p, inv_b)

    total = jnp.sum(partials)
    pad_cells = n_pad * m_pad - n * m
    if pad_cells:
        # Every padded cell has raw dot exactly 0 -> sim clips to 0.0005.
        pad_loss = -jnp.log(1.0 - jnp.float32(0.0005))
        total = total - jnp.float32(pad_cells) * pad_loss
    return total / jnp.float32(n * m)


def _reference(embedded_a, embedded_b):
    eps = 1e-12
    a = embedded_a.astype(jnp.float32)
    b = embedded_b.astype(jnp.float32)
    a_n = a / jnp.maximum(jnp.linalg.norm(a, axis=1, keepdims=True), eps)
    b_n = b / jnp.maximum(jnp.linalg.norm(b, axis=1, keepdims=True), eps)
    sim = jnp.clip(jnp.dot(a_n, b_n.T, precision=jax.lax.Precision.HIGHEST),
                   0.0005, 0.9995)
    return jnp.mean(-jnp.log(1.0 - sim))


if __name__ == "__main__":
    key = jax.random.PRNGKey(0)
    ka, kb = jax.random.split(key)
    n, m, d = 8, 8, 32  # small embedding batches, hidden size 32
    embedded_a = jax.random.normal(ka, (n, d), dtype=jnp.float32)
    embedded_b = jax.random.normal(kb, (m, d), dtype=jnp.float32)

    loss = shared_special_loss(embedded_a, embedded_b)
    loss = jax.block_until_ready(loss)

    ref = _reference(embedded_a, embedded_b)
    assert jnp.allclose(loss, ref, rtol=1e-4, atol=1e-5), (loss, ref)

    print("KERNEL_OK")
</pallas_src>

<mosaic_0001>
module attributes {stable_mosaic.version = 11 : i64} {
  func.func @_row_inv_norm_kernel(%arg0: i32, %arg1: i32, %arg2: memref<128x128xf32, #tpu.memory_space<vmem>>, %arg3: memref<128x1xf32, #tpu.memory_space<vmem>>) attributes {dimension_semantics = [#tpu.dimension_semantics<parallel>, #tpu.dimension_semantics<arbitrary>], iteration_bounds = array<i64: 1, 1>, scalar_prefetch = 0 : i64, scratch_operands = 0 : i64, tpu.core_type = #tpu.core_type<tc>, window_params = [{transform_indices = @transform_0, window_bounds = array<i64: 128, 128>}, {transform_indices = @transform_1, window_bounds = array<i64: 128, 1>}]} {
    %c0_i32 = arith.constant 0 : i32
    %0 = arith.cmpi eq, %arg1, %c0_i32 : i32
    %1 = arith.extui %0 : i1 to i32
    %c0_i32_0 = arith.constant 0 : i32
    %2 = arith.cmpi ne, %1, %c0_i32_0 : i32
    scf.if %2 {
      %cst_8 = arith.constant 0.000000e+00 : f32
      %13 = vector.broadcast %cst_8 : f32 to vector<128x1xf32>
      %c0_9 = arith.constant 0 : index
      %c0_10 = arith.constant 0 : index
      %14 = vector.load %arg3[%c0_9, %c0_10] : memref<128x1xf32, #tpu.memory_space<vmem>>, vector<128x1xf32>
      tpu.vector_store %arg3[%c0_9, %c0_10], %13 {strides = array<i32>} : memref<128x1xf32, #tpu.memory_space<vmem>>, vector<128x1xf32>,
    } else {
    }
    %c0 = arith.constant 0 : index
    %c0_1 = arith.constant 0 : index
    %3 = vector.load %arg2[%c0, %c0_1] : memref<128x128xf32, #tpu.memory_space<vmem>>, vector<128x128xf32>
    %c0_2 = arith.constant 0 : index
    %c0_3 = arith.constant 0 : index
    %4 = vector.load %arg3[%c0_2, %c0_3] : memref<128x1xf32, #tpu.memory_space<vmem>>, vector<128x1xf32>
    %5 = arith.mulf %3, %3 : vector<128x128xf32>
    %cst = arith.constant dense<0.000000e+00> : vector<128xf32>
    %6 = vector.multi_reduction <add>, %5, %cst [1] : vector<128x128xf32> to vector<128xf32>
    %7 = vector.shape_cast %6 : vector<128xf32> to vector<128x1xf32>
    %8 = arith.addf %4, %7 : vector<128x1xf32>
    %c0_4 = arith.constant 0 : index
    %c0_5 = arith.constant 0 : index
    %9 = vector.load %arg3[%c0_4, %c0_5] : memref<128x1xf32, #tpu.memory_space<vmem>>, vector<128x1xf32>
    tpu.vector_store %arg3[%c0_4, %c0_5], %8 {strides = array<i32>} : memref<128x1xf32, #tpu.memory_space<vmem>>, vector<128x1xf32>,
    %c0_i32_6 = arith.constant 0 : i32
    %10 = arith.cmpi eq, %arg1, %c0_i32_6 : i32
    %11 = arith.extui %10 : i1 to i32
    %c0_i32_7 = arith.constant 0 : i32
    %12 = arith.cmpi ne, %11, %c0_i32_7 : i32
    scf.if %12 {
      %c0_8 = arith.constant 0 : index
      %c0_9 = arith.constant 0 : index
      %13 = vector.load %arg3[%c0_8, %c0_9] : memref<128x1xf32, #tpu.memory_space<vmem>>, vector<128x1xf32>
      %14 = math.sqrt %13 : vector<128x1xf32>
      %cst_10 = arith.constant 9.99999996E-13 : f32
      %15 = vector.broadcast %cst_10 : f32 to vector<128x1xf32>
      %16 = arith.maximumf %14, %15 : vector<128x1xf32>
      %cst_11 = arith.constant 1.000000e+00 : f32
      %17 = vector.broadcast %cst_11 : f32 to vector<128x1xf32>
      %18 = arith.divf %17, %16 : vector<128x1xf32>
      %c0_12 = arith.constant 0 : index
      %c0_13 = arith.constant 0 : index
      %19 = vector.load %arg3[%c0_12, %c0_13] : memref<128x1xf32, #tpu.memory_space<vmem>>, vector<128x1xf32>
      tpu.vector_store %arg3[%c0_12, %c0_13], %18 {strides = array<i32>} : memref<128x1xf32, #tpu.memory_space<vmem>>, vector<128x1xf32>,
    } else {
    }
    return
  }
  func.func @transform_0(%arg0: i32, %arg1: i32) -> (i32, i32) {
    %c0_i32 = arith.constant 0 : i32
    return %arg0, %arg1 : i32, i32
  }
  func.func @transform_1(%arg0: i32, %arg1: i32) -> (i32, i32) {
    %c0_i32 = arith.constant 0 : i32
    %c0_i32_0 = arith.constant 0 : i32
    return %arg0, %c0_i32 : i32, i32
  }
}

</mosaic_0001>

<bundles_post_ra>
// kernel: tpu_custom_call.1
= control target key start
LH: loop header
LB: loop body
LE: loop exit
PB: predicated region body
PF: predicated region fallthrough
CT: control target
= control target key end

     0   :  { %6 = vsyncpa [#allocation3], 0  ;;  %s448_s6 = smov [#allocation2]   ;;  %s886_s0 = inlined_call_operand.hbm [shape: f32[128,128], index: 0, kind: input, shape index: {}]   ;;  %s887_s1 = inlined_call_operand.vmem [shape: f32[128,1], index: 1, kind: output, shape index: {}]  }
   0x1   :  { %s12_s7 = sshll.u32 %s448_s6, 4  ;;  %s424_s10 = scalar_lea.hbm %s886_s0, 2048  ;;  %s13_s7 = int_to_ptr.vmem [resolvable:$true] %s12_s7 }
   0x2   :  { %p425_p0 = scmp.ne.s32.totalorder %s886_s0, %s424_s10  ;;  %p428_p1 = scmp.lt.u32.totalorder %s424_s10, %s886_s0 }
   0x4   :  { %p430_p2 = pnand %p428_p1, %p425_p0 }
   0x6   :  { %433 = shalt.err (!%p430_p2)
}
   0x7   :  { %s434_s15 = scalar_lea.vmem %s13_s7, 2048  ;;  %p439_p4 = scmp.lt.s32.totalorder %s13_s7, %s13_s7 }
   0x8   :  { %p435_p3 = scmp.ne.s32.totalorder %s13_s7, %s434_s15  ;;  %p440_p5 = scmp.lt.s32.totalorder %s434_s15, %s434_s15 }
   0xa   :  { %p441_p6 = por %p440_p5, %p439_p4 }
   0xc   :  { %p442_p7 = pnand %p441_p6, %p435_p3 }
   0xe   :  { %445 = shalt.err (!%p442_p7)
}
   0xf   :  { %s449_s16 = smov 128   ;;  %s450_s17 = smov 8  }
  0x10   :  { %18 = dma.hbm_to_vmem [thread:$0]  %s886_s0, 2048, %s13_s7, [#allocation3], %s449_s16, %s449_s16, %s450_s17  }
  0x11   :  { %446 = dma.done.wait [#allocation3], 2048  }
  0x12   :  { %447 = vsyncadd [#allocation3], 4294965248  ;;  %vm26_vm0 = vcmask 7168   ;;  %v451_v0 = vmov 0.0   ;;  %v45_v1 = vld [vmem:[#allocation2 + $0x10] sm:$0xff]  ;;  %v43_v2 = vld [vmem:[#allocation2] sm:$0xff] }
  0x13   :  { %29 = vst.msk [vmem:[%s887_s1 + $0x10] sm:$0xff] %vm26_vm0, %v451_v0  ;;  %27 = vst.msk [vmem:[%s887_s1] sm:$0xff] %vm26_vm0, %v451_v0  ;;  %v46_v3 = vld [vmem:[#allocation2 + $0x18] sm:$0xff]  ;;  %v77_v4 = vmul.f32 %v45_v1, %v45_v1  ;;  %v75_v5 = vmul.f32 %v43_v2, %v43_v2  ;;  %v44_v6 = vld [vmem:[#allocation2 + $0x8] sm:$0xff] }
  0x14   :  { %28 = vst.msk [vmem:[%s887_s1 + $0x8] sm:$0xff] %vm26_vm0, %v451_v0  ;;  %30 = vst.msk [vmem:[%s887_s1 + $0x18] sm:$0xff] %vm26_vm0, %v451_v0  ;;  %v78_v7 = vmul.f32 %v46_v3, %v46_v3  ;;  %v76_v8 = vmul.f32 %v44_v6, %v44_v6  ;;  %v48_v9 = vld [vmem:[#allocation2 + $0x28] sm:$0xff]  ;;  %v47_v10 = vld [vmem:[#allocation2 + $0x20] sm:$0xff] }
  0x15   :  { %31 = vst.msk [vmem:[%s887_s1 + $0x20] sm:$0xff] %vm26_vm0, %v451_v0  ;;  %32 = vst.msk [vmem:[%s887_s1 + $0x28] sm:$0xff] %vm26_vm0, %v451_v0  ;;  %95 = vadd.xlane.f32.xlu1 %v77_v4  ;;  %91 = vadd.xlane.f32.xlu0 %v75_v5  ;;  %v80_v11 = vmul.f32 %v48_v9, %v48_v9  ;;  %v79_v12 = vmul.f32 %v47_v10, %v47_v10  ;;  %v50_v13 = vld [vmem:[#allocation2 + $0x38] sm:$0xff]  ;;  %v49_v14 = vld [vmem:[#allocation2 + $0x30] sm:$0xff] }
  0x16   :  { %33 = vst.msk [vmem:[%s887_s1 + $0x30] sm:$0xff] %vm26_vm0, %v451_v0  ;;  %34 = vst.msk [vmem:[%s887_s1 + $0x38] sm:$0xff] %vm26_vm0, %v451_v0  ;;  %v82_v15 = vmul.f32 %v50_v13, %v50_v13  ;;  %v81_v16 = vmul.f32 %v49_v14, %v49_v14  ;;  %v52_v17 = vld [vmem:[#allocation2 + $0x48] sm:$0xff]  ;;  %v51_v18 = vld [vmem:[#allocation2 + $0x40] sm:$0xff] }
  0x17   :  { %35 = vst.msk [vmem:[%s887_s1 + $0x40] sm:$0xff] %vm26_vm0, %v451_v0  ;;  %36 = vst.msk [vmem:[%s887_s1 + $0x48] sm:$0xff] %vm26_vm0, %v451_v0  ;;  %v84_v19 = vmul.f32 %v52_v17, %v52_v17  ;;  %v83_v20 = vmul.f32 %v51_v18, %v51_v18  ;;  %v54_v21 = vld [vmem:[#allocation2 + $0x58] sm:$0xff]  ;;  %v53_v22 = vld [vmem:[#allocation2 + $0x50] sm:$0xff] }
  0x18   :  { %37 = vst.msk [vmem:[%s887_s1 + $0x50] sm:$0xff] %vm26_vm0, %v451_v0  ;;  %38 = vst.msk [vmem:[%s887_s1 + $0x58] sm:$0xff] %vm26_vm0, %v451_v0  ;;  %v86_v23 = vmul.f32 %v54_v21, %v54_v21  ;;  %v85_v24 = vmul.f32 %v53_v22, %v53_v22  ;;  %v56_v25 = vld [vmem:[#allocation2 + $0x68] sm:$0xff]  ;;  %v55_v26 = vld [vmem:[#allocation2 + $0x60] sm:$0xff] }
  0x19   :  { %39 = vst.msk [vmem:[%s887_s1 + $0x60] sm:$0xff] %vm26_vm0, %v451_v0  ;;  %40 = vst.msk [vmem:[%s887_s1 + $0x68] sm:$0xff] %vm26_vm0, %v451_v0  ;;  %97 = vadd.xlane.f32.xlu1 %v78_v7  ;;  %93 = vadd.xlane.f32.xlu0 %v76_v8  ;;  %v88_v27 = vmul.f32 %v56_v25, %v56_v25  ;;  %v87_v28 = vmul.f32 %v55_v26, %v55_v26  ;;  %v58_v29 = vld [vmem:[#allocation2 + $0x78] sm:$0xff]  ;;  %v57_v30 = vld [vmem:[#allocation2 + $0x70] sm:$0xff] }
  0x1a   :  { %41 = vst.msk [vmem:[%s887_s1 + $0x70] sm:$0xff] %vm26_vm0, %v451_v0  ;;  %42 = vst.msk [vmem:[%s887_s1 + $0x78] sm:$0xff] %vm26_vm0, %v451_v0  ;;  %v90_v31 = vmul.f32 %v58_v29, %v58_v29  ;;  %v89_v32 = vmul.f32 %v57_v30, %v57_v30  ;;  %v61_v33 = vld [vmem:[%s887_s1 + $0x10] sm:$0xff]  ;;  %v59_v34 = vld [vmem:[%s887_s1] sm:$0xff] }
  0x1b   :  { %v62_v39 = vld [vmem:[%s887_s1 + $0x18] sm:$0xff]  ;;  %v60_v40 = vld [vmem:[%s887_s1 + $0x8] sm:$0xff] }
  0x1c   :  { %v64_v45 = vld [vmem:[%s887_s1 + $0x28] sm:$0xff]  ;;  %v63_v46 = vld [vmem:[%s887_s1 + $0x20] sm:$0xff] }
  0x1d   :  { %101 = vadd.xlane.f32.xlu1 %v80_v11  ;;  %99 = vadd.xlane.f32.xlu0 %v79_v12  ;;  %v66_v51 = vld [vmem:[%s887_s1 + $0x38] sm:$0xff]  ;;  %v65_v54 = vld [vmem:[%s887_s1 + $0x30] sm:$0xff] }
  0x1e   :  { %v68_v59 = vld [vmem:[%s887_s1 + $0x48] sm:$0xff]  ;;  %v67_v62 = vld [vmem:[%s887_s1 + $0x40] sm:$0xff] }
  0x1f   :  { %v70_v3 = vld [vmem:[%s887_s1 + $0x58] sm:$0xff]  ;;  %v69_v6 = vld [vmem:[%s887_s1 + $0x50] sm:$0xff] }
  0x21   :  { %105 = vadd.xlane.f32.xlu1 %v82_v15  ;;  %103 = vadd.xlane.f32.xlu0 %v81_v16 }
  0x25   :  { %109 = vadd.xlane.f32.xlu1 %v84_v19  ;;  %107 = vadd.xlane.f32.xlu0 %v83_v20  ;;  %v72_v19 = vld [vmem:[%s887_s1 + $0x68] sm:$0xff] }
  0x29   :  { %113 = vadd.xlane.f32.xlu1 %v86_v23  ;;  %111 = vadd.xlane.f32.xlu0 %v85_v24 }
  0x2d   :  { %117 = vadd.xlane.f32.xlu1 %v88_v27  ;;  %115 = vadd.xlane.f32.xlu0 %v87_v28 }
  0x31   :  { %121 = vadd.xlane.f32.xlu1 %v90_v31  ;;  %119 = vadd.xlane.f32.xlu0 %v89_v32 }
  0xa2   :  { %v96_v35 = vpop.xlane.xlu1 %95  ;;  %v92_v36 = vpop.xlane.xlu0 %91 }
  0xa3   :  { %v125_v37 = vadd.f32 %v96_v35, %v61_v33  ;;  %v123_v38 = vadd.f32 %v92_v36, %v59_v34 }
  0xa5   :  { %142 = vst.msk [vmem:[%s887_s1 + $0x10] sm:$0xff] %vm26_vm0, %v125_v37  ;;  %140 = vst.msk [vmem:[%s887_s1] sm:$0xff] %vm26_vm0, %v123_v38 }
  0xa6   :  { %v98_v41 = vpop.xlane.xlu1 %97  ;;  %v94_v42 = vpop.xlane.xlu0 %93 }
  0xa7   :  { %v126_v43 = vadd.f32 %v98_v41, %v62_v39  ;;  %v124_v44 = vadd.f32 %v94_v42, %v60_v40 }
  0xa9   :  { %143 = vst.msk [vmem:[%s887_s1 + $0x18] sm:$0xff] %vm26_vm0, %v126_v43  ;;  %141 = vst.msk [vmem:[%s887_s1 + $0x8] sm:$0xff] %vm26_vm0, %v124_v44 }
  0xaa   :  { %v102_v47 = vpop.xlane.xlu1 %101  ;;  %v100_v48 = vpop.xlane.xlu0 %99 }
  0xab   :  { %v128_v49 = vadd.f32 %v102_v47, %v64_v45  ;;  %v127_v50 = vadd.f32 %v100_v48, %v63_v46 }
  0xac   :  { %v161_v52 = vld [vmem:[%s887_s1 + $0x10] sm:$0xff]  ;;  %v581_v53 = vld [vmem:[%s887_s1] sm:$0xff] }
  0xad   :  { %360 = vrsqrt.f32 %v161_v52  ;;  %145 = vst.msk [vmem:[%s887_s1 + $0x28] sm:$0xff] %vm26_vm0, %v128_v49  ;;  %144 = vst.msk [vmem:[%s887_s1 + $0x20] sm:$0xff] %vm26_vm0, %v127_v50  ;;  %vm191_vm1 = vcmp.eq.f32.partialorder %v161_v52, inf  ;;  %vm193_vm2 = vcmp.eq.f32.partialorder %v161_v52, 0.0  ;;  %v194_v10 = vand.u32 2147483648, %v161_v52 }
  0xae   :  { %362 = vrsqrt.f32 %v581_v53  ;;  %v106_v55 = vpop.xlane.xlu1 %105  ;;  %v104_v56 = vpop.xlane.xlu0 %103  ;;  %vm177_vm3 = vcmp.eq.f32.partialorder %v581_v53, inf  ;;  %vm179_vm4 = vcmp.eq.f32.partialorder %v581_v53, 0.0  ;;  %v180_v15 = vand.u32 2147483648, %v581_v53 }
  0xaf   :  { %v130_v57 = vadd.f32 %v106_v55, %v66_v51  ;;  %v129_v58 = vadd.f32 %v104_v56, %v65_v54 }
  0xb0   :  { %v601_v60 = vld [vmem:[%s887_s1 + $0x18] sm:$0xff]  ;;  %v606_v61 = vld [vmem:[%s887_s1 + $0x8] sm:$0xff] }
  0xb1   :  { %364 = vrsqrt.f32 %v601_v60  ;;  %147 = vst.msk [vmem:[%s887_s1 + $0x38] sm:$0xff] %vm26_vm0, %v130_v57  ;;  %146 = vst.msk [vmem:[%s887_s1 + $0x30] sm:$0xff] %vm26_vm0, %v129_v58  ;;  %vm198_vm5 = vcmp.eq.f32.partialorder %v601_v60, inf  ;;  %vm200_vm6 = vcmp.eq.f32.partialorder %v601_v60, 0.0  ;;  %v201_v21 = vand.u32 2147483648, %v601_v60 }
  0xb2   :  { %366 = vrsqrt.f32 %v606_v61  ;;  %v110_v63 = vpop.xlane.xlu1 %109  ;;  %v108_v0 = vpop.xlane.xlu0 %107  ;;  %vm184_vm7 = vcmp.eq.f32.partialorder %v606_v61, inf  ;;  %vm186_vm8 = vcmp.eq.f32.partialorder %v606_v61, 0.0  ;;  %v187_v26 = vand.u32 2147483648, %v606_v61 }
  0xb3   :  { %v132_v1 = vadd.f32 %v110_v63, %v68_v59  ;;  %v131_v2 = vadd.f32 %v108_v0, %v67_v62 }
  0xb4   :  { %v627_v4 = vld [vmem:[%s887_s1 + $0x28] sm:$0xff]  ;;  %v632_v5 = vld [vmem:[%s887_s1 + $0x20] sm:$0xff] }
  0xb5   :  { %368 = vrsqrt.f32 %v627_v4  ;;  %149 = vst.msk [vmem:[%s887_s1 + $0x48] sm:$0xff] %vm26_vm0, %v132_v1  ;;  %148 = vst.msk [vmem:[%s887_s1 + $0x40] sm:$0xff] %vm26_vm0, %v131_v2  ;;  %vm212_vm9 = vcmp.eq.f32.partialorder %v627_v4, inf  ;;  %vm214_vm10 = vcmp.eq.f32.partialorder %v627_v4, 0.0  ;;  %v215_v37 = vand.u32 2147483648, %v627_v4  ;;  %v71_v1 = vld [vmem:[%s887_s1 + $0x60] sm:$0xff] }
  0xb6   :  { %370 = vrsqrt.f32 %v632_v5  ;;  %v114_v7 = vpop.xlane.xlu1 %113  ;;  %v112_v8 = vpop.xlane.xlu0 %111  ;;  %vm205_vm11 = vcmp.eq.f32.partialorder %v632_v5, inf  ;;  %vm207_vm12 = vcmp.eq.f32.partialorder %v632_v5, 0.0  ;;  %v208_v47 = vand.u32 2147483648, %v632_v5 }
  0xb7   :  { %v361_v9 = vpop.eup %360  ;;  %v134_v11 = vadd.f32 %v114_v7, %v70_v3  ;;  %v133_v12 = vadd.f32 %v112_v8, %v69_v6  ;;  %v74_v6 = vld [vmem:[%s887_s1 + $0x78] sm:$0xff]  ;;  %v73_v8 = vld [vmem:[%s887_s1 + $0x70] sm:$0xff] }
  0xb8   :  { %v363_v13 = vpop.eup %362  ;;  %v190_v14 = vmul.f32 %v361_v9, %v161_v52  ;;  %v653_v16 = vld [vmem:[%s887_s1 + $0x38] sm:$0xff]  ;;  %v658_v17 = vld [vmem:[%s887_s1 + $0x30] sm:$0xff] }
  0xb9   :  { %v176_v18 = vmul.f32 %v363_v13, %v581_v53  ;;  %372 = vrsqrt.f32 %v653_v16  ;;  %151 = vst.msk [vmem:[%s887_s1 + $0x58] sm:$0xff] %vm26_vm0, %v134_v11  ;;  %150 = vst.msk [vmem:[%s887_s1 + $0x50] sm:$0xff] %vm26_vm0, %v133_v12  ;;  %vm226_vm13 = vcmp.eq.f32.partialorder %v653_v16, inf  ;;  %vm228_vm14 = vcmp.eq.f32.partialorder %v653_v16, 0.0 }
  0xba   :  { %v192_v20 = vsel %vm191_vm1, %v161_v52, %v190_v14  ;;  %374 = vrsqrt.f32 %v658_v17  ;;  %v118_v22 = vpop.xlane.xlu1 %117  ;;  %v116_v49 = vpop.xlane.xlu0 %115  ;;  %v229_v55 = vand.u32 2147483648, %v653_v16  ;;  %vm219_vm15 = vcmp.eq.f32.partialorder %v658_v17, inf }
  0xbb   :  { %v365_v23 = vpop.eup %364  ;;  %v195_v24 = vsel %vm193_vm2, %v194_v10, %v192_v20  ;;  %v178_v25 = vsel %vm177_vm3, %v581_v53, %v176_v18  ;;  %v136_v32 = vadd.f32 %v118_v22, %v72_v19  ;;  %vm221_vm1 = vcmp.eq.f32.partialorder %v658_v17, 0.0 }
  0xbc   :  { %v367_v27 = vpop.eup %366  ;;  %v289_v28 = vmax.f32 %v195_v24, 1e-12  ;;  %v181_v29 = vsel %vm179_vm4, %v180_v15, %v178_v25  ;;  %v197_v30 = vmul.f32 %v365_v23, %v601_v60  ;;  %v691_v31 = vld [vmem:[%s887_s1 + $0x48] sm:$0xff]  ;;  %v699_v35 = vld [vmem:[%s887_s1 + $0x40] sm:$0xff]  ;;  %v222_v0 = vand.u32 2147483648, %v658_v17 }
  0xbd   :  { %v287_v33 = vmax.f32 %v181_v29, 1e-12  ;;  %v183_v34 = vmul.f32 %v367_v27, %v606_v61  ;;  %376 = vrsqrt.f32 %v691_v31  ;;  %153 = vst.msk [vmem:[%s887_s1 + $0x68] sm:$0xff] %vm26_vm0, %v136_v32  ;;  %vm240_vm2 = vcmp.eq.f32.partialorder %v691_v31, inf }
  0xbe   :  { %378 = vrcp.f32 %v289_v28  ;;  %v199_v36 = vsel %vm198_vm5, %v601_v60, %v197_v30  ;;  %v120_v7 = vpop.xlane.xlu0 %119  ;;  %vm242_vm3 = vcmp.eq.f32.partialorder %v691_v31, 0.0  ;;  %v243_v15 = vand.u32 2147483648, %v691_v31 }
  0xbf   :  { %v369_v38 = vpop.eup %368  ;;  %380 = vrcp.f32 %v287_v33  ;;  %v202_v39 = vsel %vm200_vm6, %v201_v21, %v199_v36  ;;  %v185_v40 = vsel %vm184_vm7, %v606_v61, %v183_v34  ;;  %v137_v20 = vadd.f32 %v120_v7, %v73_v8 }
  0xc0   :  { %v371_v41 = vpop.eup %370  ;;  %v290_v42 = vmax.f32 %v202_v39, 1e-12  ;;  %v188_v43 = vsel %vm186_vm8, %v187_v26, %v185_v40  ;;  %v211_v44 = vmul.f32 %v369_v38, %v627_v4  ;;  %382 = vrsqrt.f32 %v699_v35  ;;  %v726_v48 = vld [vmem:[%s887_s1 + $0x58] sm:$0xff]  ;;  %v736_v51 = vld [vmem:[%s887_s1 + $0x50] sm:$0xff] }
  0xc1   :  { %v288_v45 = vmax.f32 %v188_v43, 1e-12  ;;  %v204_v46 = vmul.f32 %v371_v41, %v632_v5  ;;  %vm233_vm4 = vcmp.eq.f32.partialorder %v699_v35, inf  ;;  %v236_v25 = vand.u32 2147483648, %v699_v35  ;;  %154 = vst.msk [vmem:[%s887_s1 + $0x70] sm:$0xff] %vm26_vm0, %v137_v20 }
  0xc2   :  { %384 = vrcp.f32 %v290_v42  ;;  %v213_v50 = vsel %vm212_vm9, %v627_v4, %v211_v44  ;;  %vm235_vm5 = vcmp.eq.f32.partialorder %v699_v35, 0.0  ;;  %vm254_vm6 = vcmp.eq.f32.partialorder %v726_v48, inf }
  0xc3   :  { %v373_v52 = vpop.eup %372  ;;  %386 = vrcp.f32 %v288_v45  ;;  %v216_v53 = vsel %vm214_vm10, %v215_v37, %v213_v50  ;;  %v206_v54 = vsel %vm205_vm11, %v632_v5, %v204_v46  ;;  %v122_v5 = vpop.xlane.xlu1 %121  ;;  %vm256_vm7 = vcmp.eq.f32.partialorder %v726_v48, 0.0 }
  0xc4   :  { %v375_v56 = vpop.eup %374  ;;  %v292_v57 = vmax.f32 %v216_v53, 1e-12  ;;  %v209_v58 = vsel %vm207_vm12, %v208_v47, %v206_v54  ;;  %v225_v59 = vmul.f32 %v373_v52, %v653_v16  ;;  %388 = vrsqrt.f32 %v726_v48  ;;  %v754_v62 = vld [vmem:[%s887_s1 + $0x68] sm:$0xff] }
  0xc5   :  { %v291_v60 = vmax.f32 %v209_v58, 1e-12  ;;  %v218_v61 = vmul.f32 %v375_v56, %v658_v17  ;;  %390 = vrsqrt.f32 %v736_v51  ;;  %v138_v19 = vadd.f32 %v122_v5, %v74_v6 }
  0xc6   :  { %392 = vrcp.f32 %v292_v57  ;;  %v227_v63 = vsel %vm226_vm13, %v653_v16, %v225_v59  ;;  %v135_v16 = vadd.f32 %v116_v49, %v71_v1  ;;  %v257_v34 = vand.u32 2147483648, %v726_v48 }
  0xc7   :  { %v377_v2 = vpop.eup %376  ;;  %394 = vrcp.f32 %v291_v60  ;;  %v230_v3 = vsel %vm228_vm14, %v229_v55, %v227_v63  ;;  %v220_v4 = vsel %vm219_vm15, %v658_v17, %v218_v61  ;;  %155 = vst.msk [vmem:[%s887_s1 + $0x78] sm:$0xff] %vm26_vm0, %v138_v19  ;;  %vm247_vm8 = vcmp.eq.f32.partialorder %v736_v51, inf }
  0xc8   :  { %v379_v9 = vpop.eup %378  ;;  %v294_v10 = vmax.f32 %v230_v3, 1e-12  ;;  %v223_v11 = vsel %vm221_vm1, %v222_v0, %v220_v4  ;;  %v239_v12 = vmul.f32 %v377_v2, %v691_v31  ;;  %396 = vrsqrt.f32 %v754_v62  ;;  %152 = vst.msk [vmem:[%s887_s1 + $0x60] sm:$0xff] %vm26_vm0, %v135_v16  ;;  %v173_v52 = vld [vmem:[%s887_s1 + $0x70] sm:$0xff] }
  0xc9   :  { %v381_v13 = vpop.eup %380  ;;  %337 = vst.msk [vmem:[%s887_s1 + $0x10] sm:$0xff] %vm26_vm0, %v379_v9  ;;  %v293_v14 = vmax.f32 %v223_v11, 1e-12  ;;  %v250_v38 = vand.u32 2147483648, %v736_v51  ;;  %vm249_vm9 = vcmp.eq.f32.partialorder %v736_v51, 0.0  ;;  %vm268_vm10 = vcmp.eq.f32.partialorder %v754_v62, inf }
  0xca   :  { %v383_v17 = vpop.eup %382  ;;  %335 = vst.msk [vmem:[%s887_s1] sm:$0xff] %vm26_vm0, %v381_v13  ;;  %398 = vrcp.f32 %v294_v10  ;;  %v241_v18 = vsel %vm240_vm2, %v691_v31, %v239_v12  ;;  %vm270_vm11 = vcmp.eq.f32.partialorder %v754_v62, 0.0  ;;  %vm275_vm1 = vcmp.eq.f32.partialorder %v173_v52, inf }
  0xcb   :  { %400 = vrcp.f32 %v293_v14  ;;  %v244_v21 = vsel %vm242_vm3, %v243_v15, %v241_v18  ;;  %v232_v22 = vmul.f32 %v383_v17, %v699_v35  ;;  %v278_v8 = vand.u32 2147483648, %v173_v52 }
  0xcc   :  { %v385_v23 = vpop.eup %384  ;;  %v296_v24 = vmax.f32 %v244_v21, 1e-12  ;;  %vm277_vm2 = vcmp.eq.f32.partialorder %v173_v52, 0.0 }
  0xcd   :  { %v387_v26 = vpop.eup %386  ;;  %338 = vst.msk [vmem:[%s887_s1 + $0x18] sm:$0xff] %vm26_vm0, %v385_v23  ;;  %v234_v27 = vsel %vm233_vm4, %v699_v35, %v232_v22 }
  0xce   :  { %v389_v28 = vpop.eup %388  ;;  %336 = vst.msk [vmem:[%s887_s1 + $0x8] sm:$0xff] %vm26_vm0, %v387_v26  ;;  %402 = vrcp.f32 %v296_v24  ;;  %v237_v29 = vsel %vm235_vm5, %v236_v25, %v234_v27  ;;  %v174_v49 = vld [vmem:[%s887_s1 + $0x78] sm:$0xff] }
  0xcf   :  { %v391_v30 = vpop.eup %390  ;;  %v295_v31 = vmax.f32 %v237_v29, 1e-12  ;;  %v253_v32 = vmul.f32 %v389_v28, %v726_v48  ;;  %v171_v42 = vld [vmem:[%s887_s1 + $0x60] sm:$0xff]  ;;  %vm282_vm14 = vcmp.eq.f32.partialorder %v174_v49, inf  ;;  %vm284_vm15 = vcmp.eq.f32.partialorder %v174_v49, 0.0 }
  0xd0   :  { %v393_v33 = vpop.eup %392  ;;  %v246_v35 = vmul.f32 %v391_v30, %v736_v51  ;;  %vm261_vm12 = vcmp.eq.f32.partialorder %v171_v42, inf  ;;  %v264_v60 = vand.u32 2147483648, %v171_v42  ;;  %vm263_vm13 = vcmp.eq.f32.partialorder %v171_v42, 0.0 }
  0xd1   :  { %v395_v36 = vpop.eup %394  ;;  %340 = vst.msk [vmem:[%s887_s1 + $0x28] sm:$0xff] %vm26_vm0, %v393_v33  ;;  %404 = vrcp.f32 %v295_v31  ;;  %v255_v37 = vsel %vm254_vm6, %v726_v48, %v253_v32  ;;  %v271_v48 = vand.u32 2147483648, %v754_v62  ;;  %v285_v5 = vand.u32 2147483648, %v174_v49 }
  0xd2   :  { %v397_v39 = vpop.eup %396  ;;  %339 = vst.msk [vmem:[%s887_s1 + $0x20] sm:$0xff] %vm26_vm0, %v395_v36  ;;  %v258_v40 = vsel %vm256_vm7, %v257_v34, %v255_v37  ;;  %v248_v41 = vsel %vm247_vm8, %v736_v51, %v246_v35  ;;  %406 = vrsqrt.f32 %v171_v42 }
  0xd3   :  { %v298_v43 = vmax.f32 %v258_v40, 1e-12  ;;  %v251_v44 = vsel %vm249_vm9, %v250_v38, %v248_v41  ;;  %v267_v45 = vmul.f32 %v397_v39, %v754_v62 }
  0xd4   :  { %v399_v46 = vpop.eup %398  ;;  %v297_v47 = vmax.f32 %v251_v44, 1e-12 }
  0xd5   :  { %v401_v50 = vpop.eup %400  ;;  %342 = vst.msk [vmem:[%s887_s1 + $0x38] sm:$0xff] %vm26_vm0, %v399_v46  ;;  %408 = vrcp.f32 %v298_v43  ;;  %v269_v51 = vsel %vm268_vm10, %v754_v62, %v267_v45 }
  0xd6   :  { %341 = vst.msk [vmem:[%s887_s1 + $0x30] sm:$0xff] %vm26_vm0, %v401_v50  ;;  %410 = vrcp.f32 %v297_v47  ;;  %v272_v53 = vsel %vm270_vm11, %v271_v48, %v269_v51 }
  0xd7   :  { %v300_v54 = vmax.f32 %v272_v53, 1e-12  ;;  %412 = vrsqrt.f32 %v174_v49 }
  0xd8   :  { %v403_v55 = vpop.eup %402  ;;  %414 = vrsqrt.f32 %v173_v52 }
  0xd9   :  { %344 = vst.msk [vmem:[%s887_s1 + $0x48] sm:$0xff] %vm26_vm0, %v403_v55  ;;  %416 = vrcp.f32 %v300_v54 }
  0xdb   :  { %v405_v56 = vpop.eup %404 }
  0xdc   :  { %343 = vst.msk [vmem:[%s887_s1 + $0x40] sm:$0xff] %vm26_vm0, %v405_v56  ;;  %v407_v57 = vpop.eup %406 }
  0xdd   :  { %v260_v58 = vmul.f32 %v407_v57, %v171_v42 }
  0xdf   :  { %v409_v59 = vpop.eup %408  ;;  %v262_v62 = vsel %vm261_vm12, %v171_v42, %v260_v58 }
  0xe0   :  { %v411_v61 = vpop.eup %410  ;;  %346 = vst.msk [vmem:[%s887_s1 + $0x58] sm:$0xff] %vm26_vm0, %v409_v59  ;;  %v265_v0 = vsel %vm263_vm13, %v264_v60, %v262_v62 }
  0xe1   :  { %v413_v63 = vpop.eup %412  ;;  %345 = vst.msk [vmem:[%s887_s1 + $0x50] sm:$0xff] %vm26_vm0, %v411_v61  ;;  %v299_v2 = vmax.f32 %v265_v0, 1e-12 }
  0xe2   :  { %v415_v1 = vpop.eup %414  ;;  %v281_v3 = vmul.f32 %v413_v63, %v174_v49 }
  0xe3   :  { %v417_v4 = vpop.eup %416  ;;  %v274_v6 = vmul.f32 %v415_v1, %v173_v52  ;;  %418 = vrcp.f32 %v299_v2 }
  0xe4   :  { %348 = vst.msk [vmem:[%s887_s1 + $0x68] sm:$0xff] %vm26_vm0, %v417_v4  ;;  %v283_v7 = vsel %vm282_vm14, %v174_v49, %v281_v3 }
  0xe5   :  { %v286_v9 = vsel %vm284_vm15, %v285_v5, %v283_v7  ;;  %v276_v10 = vsel %vm275_vm1, %v173_v52, %v274_v6 }
  0xe6   :  { %v302_v11 = vmax.f32 %v286_v9, 1e-12  ;;  %v279_v12 = vsel %vm277_vm2, %v278_v8, %v276_v10 }
  0xe7   :  { %v301_v13 = vmax.f32 %v279_v12, 1e-12 }
  0xe8   :  { %420 = vrcp.f32 %v302_v11 }
  0xe9   :  { %422 = vrcp.f32 %v301_v13 }
  0xed   :  { %v419_v14 = vpop.eup %418 }
  0xee   :  { %347 = vst.msk [vmem:[%s887_s1 + $0x60] sm:$0xff] %vm26_vm0, %v419_v14 }
  0xf2   :  { %v421_v15 = vpop.eup %420 }
  0xf3   :  { %v423_v16 = vpop.eup %422  ;;  %350 = vst.msk [vmem:[%s887_s1 + $0x78] sm:$0xff] %vm26_vm0, %v421_v15 }
  0xf4   :  { %349 = vst.msk [vmem:[%s887_s1 + $0x70] sm:$0xff] %vm26_vm0, %v423_v16 }
  0xf5   :  { %355 = vsyncpa [#allocation3], 1 }

</bundles_post_ra>
